<compile_context>
chip_gen: v5e
topology: v5e:2x2
jax: 0.10.0
libtpu: 0.0.40
codegen_flags: <defaults>
</compile_context>

<pallas_src>
import functools

import jax
import jax.numpy as jnp
from jax import lax
from jax.experimental import pallas as pl
from jax.experimental.pallas import tpu as pltpu


def _round_up(x, m):
    return ((x + m - 1) // m) * m


def _pick_row_tile(row_tile, n_anchor, nc_pad, d_pad):
    """Choose a row tile (multiple of 16) that keeps the kernel inside VMEM."""
    if row_tile is None:
        row_tile = min(256, _round_up(max(n_anchor, 1), 16))
    row_tile = max(16, _round_up(int(row_tile), 16))

    budget = 40 * 1024 * 1024  # leave headroom under the 64 MiB request

    def est(tm):
        resident = nc_pad * d_pad * 2                       # bf16 contrast (revisited block)
        strips = 2 * tm * d_pad * 2 + 2 * tm * nc_pad * 4   # anchor dbl-buf + mask strip
        temps = 3 * tm * nc_pad * 4                         # sims / exp / masks (f32)
        return resident + strips + temps

    while row_tile > 16 and est(row_tile) > budget:
        row_tile = max(16, _round_up(row_tile // 2, 16))
    return row_tile


def _strip_loss_sum(sims, pos_base, row_start, n_anchor, n_contrast):
    """Sum over valid anchor rows of mean-log-prob over positives (one strip).

    sims:      [TM, NC] f32 similarities, already scaled by 1/temperature.
    pos_base:  [TM, NC] f32 positive-pair mask BEFORE self-contrast removal.
    row_start: traced scalar, global index of the first anchor row of the strip.
    n_anchor, n_contrast: static valid (un-padded) row / column counts.
    """
    tm, nc = sims.shape
    col_ids = lax.broadcasted_iota(jnp.int32, (tm, nc), 1)
    row_ids = row_start + lax.broadcasted_iota(jnp.int32, (tm, nc), 0)

    col_valid = col_ids < n_contrast
    # logits_mask: drop padded columns and the self-contrast entry (anchor i
    # vs contrast column i) — matches torch.scatter(ones, 1, arange(A), 0).
    logits_mask = jnp.logical_and(col_valid, col_ids != row_ids).astype(jnp.float32)
    pos_mask = pos_base * logits_mask

    # Numerical stabilization (the shift cancels exactly in log-prob).
    row_max = jnp.max(sims, axis=1, keepdims=True)                    # [TM, 1]
    logits = sims - row_max                                           # [TM, NC]

    exp_logits = jnp.exp(logits) * logits_mask                        # [TM, NC]
    log_denom = jnp.log(jnp.sum(exp_logits, axis=1, keepdims=True))   # [TM, 1]

    # sum_j pos*log_prob == sum_j pos*logits - pos_cnt*log_denom
    # (avoids materializing a [TM, NC] log_prob buffer).
    pos_sum = jnp.sum(pos_mask * logits, axis=1, keepdims=True)       # [TM, 1]
    pos_cnt = jnp.sum(pos_mask, axis=1, keepdims=True)                # [TM, 1]

    # NOTE: the torch reference divides by pos_cnt directly and yields NaN for
    # anchors with no positives; we clamp the denominator (pos_sum is 0 there).
    safe_cnt = jnp.maximum(pos_cnt, 1.0)
    inv_cnt = pl.reciprocal(safe_cnt, approx=True)                    # EUP, ~free
    mean_log_prob_pos = (pos_sum - pos_cnt * log_denom) * inv_cnt     # [TM, 1]

    row_valid = row_ids[:, 0:1] < n_anchor                            # [TM, 1]
    return jnp.sum(jnp.where(row_valid, mean_log_prob_pos, 0.0))


def _supcon_labels_kernel(lab_row_ref, lab_col_ref, arow_ref, call_ref,
                          out_ref, acc_ref, *, row_tile, n_anchor, n_contrast,
                          final_scale):
    i = pl.program_id(0)

    @pl.when(i == 0)
    def _init():
        acc_ref[...] = jnp.zeros_like(acc_ref)

    # [TM, NC] similarity strip on the MXU; contraction on the feature dim of
    # both operands (A @ C^T with no explicit transpose / relayout of C).
    sims = lax.dot_general(
        arow_ref[...], call_ref[...],
        dimension_numbers=(((1,), (1,)), ((), ())),
        preferred_element_type=jnp.float32)

    # Positive-pair mask rebuilt on the fly from label vectors — replaces an
    # [N, N] float mask DMA.
    pos_base = (lab_row_ref[...] == lab_col_ref[...]).astype(jnp.float32)

    acc_ref[...] += _strip_loss_sum(sims, pos_base, i * row_tile,
                                    n_anchor, n_contrast)

    @pl.when(i == pl.num_programs(0) - 1)
    def _fini():
        out_ref[...] = acc_ref[...] * final_scale


def _supcon_mask_kernel(posrow_ref, arow_ref, call_ref,
                        out_ref, acc_ref, *, row_tile, n_anchor, n_contrast,
                        final_scale):
    # Fallback for an explicit user-supplied `mask` (can be asymmetric):
    # the tiled mask is row-striped, so only a [TM, NC] strip is live.
    i = pl.program_id(0)

    @pl.when(i == 0)
    def _init():
        acc_ref[...] = jnp.zeros_like(acc_ref)

    sims = lax.dot_general(
        arow_ref[...], call_ref[...],
        dimension_numbers=(((1,), (1,)), ((), ())),
        preferred_element_type=jnp.float32)

    acc_ref[...] += _strip_loss_sum(sims, posrow_ref[...], i * row_tile,
                                    n_anchor, n_contrast)

    @pl.when(i == pl.num_programs(0) - 1)
    def _fini():
        out_ref[...] = acc_ref[...] * final_scale


def supcon_loss_pallas(features, labels=None, mask=None, temperature=0.07,
                       contrast_mode='all', base_temperature=0.07,
                       row_tile=None):
    """features: [bsz, n_views, ...] (flattened to [bsz, n_views, dim])."""
    if features.ndim < 3:
        raise ValueError('`features` needs to be [bsz, n_views, ...], '
                         'at least 3 dimensions are required')
    if features.ndim > 3:
        features = features.reshape(features.shape[0], features.shape[1], -1)
    bsz, n_views, dim = features.shape

    if labels is not None and mask is not None:
        raise ValueError('Cannot define both `labels` and `mask`')
    if contrast_mode == 'one':
        anchor_count = 1
    elif contrast_mode == 'all':
        anchor_count = n_views
    else:
        raise ValueError('Unknown mode: {}'.format(contrast_mode))

    # contrast_feature = cat(unbind(features, 1), 0): view-major [V*B, D].
    cf = jnp.transpose(features, (1, 0, 2)).reshape(n_views * bsz, dim)
    n_contrast = n_views * bsz
    n_anchor = anchor_count * bsz
    af = cf[:n_anchor]   # 'all' -> cf itself; 'one' -> view-0 rows.

    # Fold 1/temperature into the operands: (f*rsqrt(t)) @ (f*rsqrt(t))^T
    # == (f @ f^T) / t, so no per-element divide on the N^2 path.
    inv_sqrt_t = 1.0 / float(temperature) ** 0.5
    cf = cf.astype(jnp.float32) * inv_sqrt_t
    af = af.astype(jnp.float32) * inv_sqrt_t

    # Padding / tiling: lane dim -> x128, bf16 row strips -> multiple of 16.
    d_pad = _round_up(max(dim, 1), 128)
    nc_pad = _round_up(n_contrast, 128)
    row_tile = _pick_row_tile(row_tile, n_anchor, nc_pad, d_pad)
    na_pad = _round_up(n_anchor, row_tile)
    num_tiles = na_pad // row_tile

    # bf16 MXU operands (softmax / log math stays in f32 inside the kernel).
    cf_p = jnp.pad(cf.astype(jnp.bfloat16),
                   ((0, nc_pad - n_contrast), (0, d_pad - dim)))
    af_p = jnp.pad(af.astype(jnp.bfloat16),
                   ((0, na_pad - n_anchor), (0, d_pad - dim)))

    final_scale = -(float(temperature) / float(base_temperature)) / n_anchor
    compiler_params = pltpu.CompilerParams(
        dimension_semantics=("arbitrary",),   # row axis is a scalar reduction
        vmem_limit_bytes=64 * 1024 * 1024)

    if mask is None:
        if labels is None:
            base_labels = jnp.arange(bsz, dtype=jnp.int32)   # SimCLR: eye(bsz)
        else:
            labels = jnp.asarray(labels).reshape(-1)
            if labels.shape[0] != bsz:
                raise ValueError('Num of labels does not match num of features')
            base_labels = labels.astype(jnp.int32)
        lab_contrast = jnp.tile(base_labels, n_views)                 # [N]
        lab_anchor = lab_contrast[:n_anchor]                          # [A]
        lab_col = jnp.pad(lab_contrast, (0, nc_pad - n_contrast),
                          constant_values=-1).reshape(1, nc_pad)
        lab_row = jnp.pad(lab_anchor, (0, na_pad - n_anchor),
                          constant_values=-1).reshape(na_pad, 1)

        kernel = functools.partial(
            _supcon_labels_kernel, row_tile=row_tile, n_anchor=n_anchor,
            n_contrast=n_contrast, final_scale=final_scale)
        grid_spec = pltpu.PrefetchScalarGridSpec(
            num_scalar_prefetch=0, grid=(num_tiles,),
            in_specs=[
                pl.BlockSpec((row_tile, 1), lambda i: (i, 0)),        # lab_row
                pl.BlockSpec((1, nc_pad), lambda i: (0, 0)),          # lab_col
                pl.BlockSpec((row_tile, d_pad), lambda i: (i, 0)),    # anchor strip
                pl.BlockSpec((nc_pad, d_pad), lambda i: (0, 0)),      # contrast (resident)
            ],
            out_specs=pl.BlockSpec((1, 1), lambda i: (0, 0)),
            scratch_shapes=[pltpu.VMEM((1, 1), jnp.float32)],
        )
        out = pl.pallas_call(
            kernel,
            out_shape=jax.ShapeDtypeStruct((1, 1), jnp.float32),
            grid_spec=grid_spec,
            compiler_params=compiler_params,
        )(lab_row, lab_col, af_p, cf_p)
    else:
        base_mask = jnp.asarray(mask, jnp.float32)
        full_mask = jnp.tile(base_mask, (anchor_count, n_views))      # [A, N]
        full_mask = jnp.pad(full_mask, ((0, na_pad - n_anchor),
                                        (0, nc_pad - n_contrast)))

        kernel = functools.partial(
            _supcon_mask_kernel, row_tile=row_tile, n_anchor=n_anchor,
            n_contrast=n_contrast, final_scale=final_scale)
        grid_spec = pltpu.PrefetchScalarGridSpec(
            num_scalar_prefetch=0, grid=(num_tiles,),
            in_specs=[
                pl.BlockSpec((row_tile, nc_pad), lambda i: (i, 0)),   # mask strip
                pl.BlockSpec((row_tile, d_pad), lambda i: (i, 0)),    # anchor strip
                pl.BlockSpec((nc_pad, d_pad), lambda i: (0, 0)),      # contrast (resident)
            ],
            out_specs=pl.BlockSpec((1, 1), lambda i: (0, 0)),
            scratch_shapes=[pltpu.VMEM((1, 1), jnp.float32)],
        )
        out = pl.pallas_call(
            kernel,
            out_shape=jax.ShapeDtypeStruct((1, 1), jnp.float32),
            grid_spec=grid_spec,
            compiler_params=compiler_params,
        )(full_mask, af_p, cf_p)

    return out[0, 0]


def _supcon_loss_ref(features, labels=None, mask=None, temperature=0.07,
                     contrast_mode='all', base_temperature=0.07,
                     matmul_dtype=jnp.float32):
    """Pure-JAX reference mirroring the PyTorch forward.

    matmul_dtype=jnp.bfloat16 mirrors the kernel's MXU operand dtype so a
    tight comparison is possible; float32 is the torch-faithful baseline.
    """
    if features.ndim > 3:
        features = features.reshape(features.shape[0], features.shape[1], -1)
    bsz, n_views, dim = features.shape
    if labels is None and mask is None:
        base_mask = jnp.eye(bsz, dtype=jnp.float32)
    elif labels is not None:
        labels = jnp.asarray(labels).reshape(-1, 1)
        base_mask = (labels == labels.T).astype(jnp.float32)
    else:
        base_mask = jnp.asarray(mask, jnp.float32)
    cf = jnp.transpose(features, (1, 0, 2)).reshape(n_views * bsz, dim)
    anchor_count = n_views if contrast_mode == 'all' else 1
    n_a, n_c = anchor_count * bsz, n_views * bsz
    af = cf[:n_a]
    inv_sqrt_t = 1.0 / float(temperature) ** 0.5
    a_op = (af.astype(jnp.float32) * inv_sqrt_t).astype(matmul_dtype)
    c_op = (cf.astype(jnp.float32) * inv_sqrt_t).astype(matmul_dtype)
    adc = jnp.dot(a_op, c_op.T, preferred_element_type=jnp.float32)
    logits = adc - jnp.max(adc, axis=1, keepdims=True)
    logits_mask = 1.0 - jnp.eye(n_a, n_c, dtype=jnp.float32)
    msk = jnp.tile(base_mask, (anchor_count, n_views)) * logits_mask
    exp_logits = jnp.exp(logits) * logits_mask
    log_prob = logits - jnp.log(jnp.sum(exp_logits, axis=1, keepdims=True))
    mean_log_prob_pos = jnp.sum(msk * log_prob, axis=1) / jnp.sum(msk, axis=1)
    loss = -(temperature / base_temperature) * mean_log_prob_pos
    return jnp.mean(loss)


if __name__ == "__main__":
    key = jax.random.PRNGKey(0)
    bsz, n_views, dim = 16, 2, 32
    kf, kl = jax.random.split(key)
    features = jax.random.normal(kf, (bsz, n_views, dim), dtype=jnp.float32)
    features = features / jnp.linalg.norm(features, axis=-1, keepdims=True)
    labels = jax.random.randint(kl, (bsz,), 0, 4)

    # Unsupervised (SimCLR). row_tile=16 forces a 2-step row-strip grid so the
    # cross-tile scratch accumulation path is exercised even at this size.
    loss_unsup = supcon_loss_pallas(features, row_tile=16)
    jax.block_until_ready(loss_unsup)

    # Supervised with labels (auto tiling -> single strip).
    loss_sup = supcon_loss_pallas(features, labels=labels)
    # Supervised via an explicit mask (exercises the mask-strip kernel).
    sup_mask = (labels.reshape(-1, 1) == labels.reshape(1, -1)).astype(jnp.float32)
    loss_mask = supcon_loss_pallas(features, mask=sup_mask, row_tile=16)
    # contrast_mode='one' (anchor = view 0 only).
    loss_one = supcon_loss_pallas(features, labels=labels, contrast_mode='one')
    jax.block_until_ready((loss_sup, loss_mask, loss_one))

    # Checks: tight vs a reference that mirrors the kernel's bf16 MXU operands,
    # loose vs the full-f32 torch-faithful math (bf16 inputs + approx
    # reciprocal account for the gap).
    def check(got, name, **kw):
        ref_bf16 = _supcon_loss_ref(features, matmul_dtype=jnp.bfloat16, **kw)
        ref_f32 = _supcon_loss_ref(features, **kw)
        assert jnp.allclose(got, ref_bf16, atol=2e-2, rtol=2e-2), \
            (name, float(got), float(ref_bf16))
        assert jnp.allclose(got, ref_f32, atol=1e-1, rtol=1e-1), \
            (name, float(got), float(ref_f32))

    check(loss_unsup, "unsup")
    check(loss_sup, "sup", labels=labels)
    check(loss_one, "one", labels=labels, contrast_mode='one')
    # Labels path and explicit-mask path implement the same math.
    assert jnp.allclose(loss_mask, loss_sup, atol=1e-4, rtol=1e-4), \
        (float(loss_mask), float(loss_sup))

    print("KERNEL_OK")
</pallas_src>

<mosaic_0001>
module attributes {stable_mosaic.version = 11 : i64} {
  func.func @_supcon_labels_kernel(%arg0: i32, %arg1: memref<16x1xi32, #tpu.memory_space<vmem>>, %arg2: memref<1x128xi32, #tpu.memory_space<vmem>>, %arg3: memref<16x128xbf16, #tpu.memory_space<vmem>>, %arg4: memref<128x128xbf16, #tpu.memory_space<vmem>>, %arg5: memref<1x1xf32, #tpu.memory_space<vmem>>, %arg6: memref<1x1xf32, #tpu.memory_space<vmem>>) attributes {dimension_semantics = [#tpu.dimension_semantics<arbitrary>], iteration_bounds = array<i64: 2>, scalar_prefetch = 0 : i64, scratch_operands = 1 : i64, tpu.core_type = #tpu.core_type<tc>, window_params = [{transform_indices = @transform_0, window_bounds = array<i64: 16, 1>}, {pipeline_mode = #tpu.pipeline_mode<synchronous>, transform_indices = @transform_1, window_bounds = array<i64: 1, 128>}, {transform_indices = @transform_2, window_bounds = array<i64: 16, 128>}, {pipeline_mode = #tpu.pipeline_mode<synchronous>, transform_indices = @transform_3, window_bounds = array<i64: 128, 128>}, {pipeline_mode = #tpu.pipeline_mode<synchronous>, transform_indices = @transform_4, window_bounds = array<i64: 1, 1>}]} {
    %c0_i32 = arith.constant 0 : i32
    %0 = arith.cmpi eq, %arg0, %c0_i32 : i32
    %1 = arith.extui %0 : i1 to i32
    %c0_i32_0 = arith.constant 0 : i32
    %2 = arith.cmpi ne, %1, %c0_i32_0 : i32
    scf.if %2 {
      %cst_21 = arith.constant 0.000000e+00 : f32
      %61 = vector.broadcast %cst_21 : f32 to vector<1x1xf32>
      %c0_22 = arith.constant 0 : index
      %c0_23 = arith.constant 0 : index
      %62 = vector.load %arg6[%c0_22, %c0_23] : memref<1x1xf32, #tpu.memory_space<vmem>>, vector<1x1xf32>
      tpu.vector_store %arg6[%c0_22, %c0_23], %61 {strides = array<i32>} : memref<1x1xf32, #tpu.memory_space<vmem>>, vector<1x1xf32>,
    } else {
    }
    %c0 = arith.constant 0 : index
    %c0_1 = arith.constant 0 : index
    %3 = vector.load %arg3[%c0, %c0_1] : memref<16x128xbf16, #tpu.memory_space<vmem>>, vector<16x128xbf16>
    %c0_2 = arith.constant 0 : index
    %c0_3 = arith.constant 0 : index
    %4 = vector.load %arg4[%c0_2, %c0_3] : memref<128x128xbf16, #tpu.memory_space<vmem>>, vector<128x128xbf16>
    %cst = arith.constant dense<0.000000e+00> : vector<16x128xf32>
    %5 = tpu.matmul %3, %4, %cst {dimension_numbers = #tpu.dot_dimension_numbers<[1], [1], [0], [0], [0, 0, 1, 0], [], []>} : vector<16x128xbf16>, vector<128x128xbf16>, vector<16x128xf32> -> vector<16x128xf32>
    %c0_4 = arith.constant 0 : index
    %c0_5 = arith.constant 0 : index
    %6 = vector.load %arg1[%c0_4, %c0_5] : memref<16x1xi32, #tpu.memory_space<vmem>>, vector<16x1xi32>
    %c0_6 = arith.constant 0 : index
    %c0_7 = arith.constant 0 : index
    %7 = vector.load %arg2[%c0_6, %c0_7] : memref<1x128xi32, #tpu.memory_space<vmem>>, vector<1x128xi32>
    %8 = vector.broadcast %6 : vector<16x1xi32> to vector<16x128xi32>
    %9 = vector.broadcast %7 : vector<1x128xi32> to vector<16x128xi32>
    %10 = arith.cmpi eq, %8, %9 : vector<16x128xi32>
    %11 = arith.extui %10 : vector<16x128xi1> to vector<16x128xi32>
    %12 = arith.sitofp %11 : vector<16x128xi32> to vector<16x128xf32>
    %c0_8 = arith.constant 0 : index
    %c0_9 = arith.constant 0 : index
    %13 = vector.load %arg6[%c0_8, %c0_9] : memref<1x1xf32, #tpu.memory_space<vmem>>, vector<1x1xf32>
    %c16_i32 = arith.constant 16 : i32
    %14 = arith.muli %arg0, %c16_i32 : i32
    %15 = tpu.iota {dimensions = array<i32: 1>} : vector<16x128xi32>
    %16 = tpu.iota {dimensions = array<i32: 0>} : vector<16x128xi32>
    %17 = vector.broadcast %14 : i32 to vector<16x128xi32>
    %18 = arith.addi %17, %16 : vector<16x128xi32>
    %c32_i32 = arith.constant 32 : i32
    %19 = vector.broadcast %c32_i32 : i32 to vector<16x128xi32>
    %20 = arith.cmpi slt, %15, %19 : vector<16x128xi32>
    %21 = arith.cmpi ne, %15, %18 : vector<16x128xi32>
    %22 = arith.andi %20, %21 : vector<16x128xi1>
    %23 = arith.extui %22 : vector<16x128xi1> to vector<16x128xi32>
    %24 = arith.sitofp %23 : vector<16x128xi32> to vector<16x128xf32>
    %25 = arith.mulf %12, %24 : vector<16x128xf32>
    %cst_10 = arith.constant dense<0xFF800000> : vector<16xf32>
    %26 = vector.multi_reduction <maximumf>, %5, %cst_10 [1] : vector<16x128xf32> to vector<16xf32>
    %27 = vector.shape_cast %26 : vector<16xf32> to vector<16x1xf32>
    %28 = vector.broadcast %27 : vector<16x1xf32> to vector<16x128xf32>
    %29 = arith.subf %5, %28 : vector<16x128xf32>
    %30 = math.exp %29 : vector<16x128xf32>
    %31 = arith.mulf %30, %24 : vector<16x128xf32>
    %cst_11 = arith.constant dense<0.000000e+00> : vector<16xf32>
    %32 = vector.multi_reduction <add>, %31, %cst_11 [1] : vector<16x128xf32> to vector<16xf32>
    %33 = vector.shape_cast %32 : vector<16xf32> to vector<16x1xf32>
    %34 = math.log %33 : vector<16x1xf32>
    %35 = arith.mulf %25, %29 : vector<16x128xf32>
    %cst_12 = arith.constant dense<0.000000e+00> : vector<16xf32>
    %36 = vector.multi_reduction <add>, %35, %cst_12 [1] : vector<16x128xf32> to vector<16xf32>
    %37 = vector.shape_cast %36 : vector<16xf32> to vector<16x1xf32>
    %cst_13 = arith.constant dense<0.000000e+00> : vector<16xf32>
    %38 = vector.multi_reduction <add>, %25, %cst_13 [1] : vector<16x128xf32> to vector<16xf32>
    %39 = vector.shape_cast %38 : vector<16xf32> to vector<16x1xf32>
    %cst_14 = arith.constant 1.000000e+00 : f32
    %40 = vector.broadcast %cst_14 : f32 to vector<16x1xf32>
    %41 = arith.maximumf %39, %40 : vector<16x1xf32>
    %42 = tpu.reciprocal %41 {approx = true} : vector<16x1xf32> -> vector<16x1xf32>
    %43 = arith.mulf %39, %34 : vector<16x1xf32>
    %44 = arith.subf %37, %43 : vector<16x1xf32>
    %45 = arith.mulf %44, %42 : vector<16x1xf32>
    %46 = vector.extract_strided_slice %18 {offsets = [0, 0], sizes = [16, 1], strides = [1, 1]} : vector<16x128xi32> to vector<16x1xi32>
    %c32_i32_15 = arith.constant 32 : i32
    %47 = vector.broadcast %c32_i32_15 : i32 to vector<16x1xi32>
    %48 = arith.cmpi slt, %46, %47 : vector<16x1xi32>
    %cst_16 = arith.constant 0.000000e+00 : f32
    %49 = vector.broadcast %cst_16 : f32 to vector<16x1xf32>
    %50 = arith.select %48, %45, %49 : vector<16x1xi1>, vector<16x1xf32>
    %51 = vector.shape_cast %50 : vector<16x1xf32> to vector<1x16x1xf32>
    %cst_17 = arith.constant dense<0.000000e+00> : vector<1xf32>
    %52 = vector.multi_reduction <add>, %51, %cst_17 [1, 2] : vector<1x16x1xf32> to vector<1xf32>
    %53 = vector.shape_cast %52 : vector<1xf32> to vector<1x1x1xf32>
    %54 = vector.extract %53[0, 0, 0] : f32 from vector<1x1x1xf32>
    %55 = vector.broadcast %54 : f32 to vector<1x1xf32>
    %56 = arith.addf %13, %55 : vector<1x1xf32>
    %c0_18 = arith.constant 0 : index
    %c0_19 = arith.constant 0 : index
    %57 = vector.load %arg6[%c0_18, %c0_19] : memref<1x1xf32, #tpu.memory_space<vmem>>, vector<1x1xf32>
    tpu.vector_store %arg6[%c0_18, %c0_19], %56 {strides = array<i32>} : memref<1x1xf32, #tpu.memory_space<vmem>>, vector<1x1xf32>,
    %c1_i32 = arith.constant 1 : i32
    %58 = arith.cmpi eq, %arg0, %c1_i32 : i32
    %59 = arith.extui %58 : i1 to i32
    %c0_i32_20 = arith.constant 0 : i32
    %60 = arith.cmpi ne, %59, %c0_i32_20 : i32
    scf.if %60 {
      %c0_21 = arith.constant 0 : index
      %c0_22 = arith.constant 0 : index
      %61 = vector.load %arg6[%c0_21, %c0_22] : memref<1x1xf32, #tpu.memory_space<vmem>>, vector<1x1xf32>
      %cst_23 = arith.constant -3.125000e-02 : f32
      %62 = vector.broadcast %cst_23 : f32 to vector<1x1xf32>
      %63 = arith.mulf %61, %62 : vector<1x1xf32>
      %c0_24 = arith.constant 0 : index
      %c0_25 = arith.constant 0 : index
      %64 = vector.load %arg5[%c0_24, %c0_25] : memref<1x1xf32, #tpu.memory_space<vmem>>, vector<1x1xf32>
      tpu.vector_store %arg5[%c0_24, %c0_25], %63 {strides = array<i32>} : memref<1x1xf32, #tpu.memory_space<vmem>>, vector<1x1xf32>,
    } else {
    }
    return
  }
  func.func @transform_0(%arg0: i32) -> (i32, i32) {
    %c0_i32 = arith.constant 0 : i32
    %c0_i32_0 = arith.constant 0 : i32
    return %arg0, %c0_i32 : i32, i32
  }
  func.func @transform_1(%arg0: i32) -> (i32, i32) {
    %c0_i32 = arith.constant 0 : i32
    %c0_i32_0 = arith.constant 0 : i32
    %c0_i32_1 = arith.constant 0 : i32
    return %c0_i32, %c0_i32_0 : i32, i32
  }
  func.func @transform_2(%arg0: i32) -> (i32, i32) {
    %c0_i32 = arith.constant 0 : i32
    %c0_i32_0 = arith.constant 0 : i32
    return %arg0, %c0_i32 : i32, i32
  }
  func.func @transform_3(%arg0: i32) -> (i32, i32) {
    %c0_i32 = arith.constant 0 : i32
    %c0_i32_0 = arith.constant 0 : i32
    %c0_i32_1 = arith.constant 0 : i32
    return %c0_i32, %c0_i32_0 : i32, i32
  }
  func.func @transform_4(%arg0: i32) -> (i32, i32) {
    %c0_i32 = arith.constant 0 : i32
    %c0_i32_0 = arith.constant 0 : i32
    %c0_i32_1 = arith.constant 0 : i32
    return %c0_i32, %c0_i32_0 : i32, i32
  }
}

</mosaic_0001>

<bundles_post_ra>
// kernel: tpu_custom_call.1
= control target key start
LH: loop header
LB: loop body
LE: loop exit
PB: predicated region body
PF: predicated region fallthrough
CT: control target
= control target key end

     0   :  { %9 = vsyncpa [#allocation4], 0  ;;  %s754_s0 = inlined_call_operand.vmem [shape: s32[32,1], index: 0, kind: input, shape index: {}]   ;;  %s755_s1 = inlined_call_operand.vmem [shape: s32[1,128], index: 1, kind: input, shape index: {}]   ;;  %s756_s2 = inlined_call_operand.vmem [shape: bf16[32,128], index: 2, kind: input, shape index: {}]   ;;  %s757_s3 = inlined_call_operand.hbm [shape: bf16[128,128], index: 3, kind: input, shape index: {}]   ;;  %s758_s4 = inlined_call_operand.hbm [shape: f32[1,1], index: 4, kind: output, shape index: {}]  }
   0x1   :  { %10 = vsyncpa [#allocation5], 0  ;;  %s714_s15 = smov 0  }
   0x2 LB: > { %s150_s18 = sshll.u32 %s757_s3, 4  ;;  %s723_s19 = sadd.s32 4294967295, %s680_s15   ;;  %s680_s15 = sphi %s714_s15, %s16_s15   ;;  %s151_s18 = int_to_ptr.hbm [resolvable:$true] %s150_s18 }
   0x3   : > { %p495_p0 = scmp.ge.s32.totalorder %s680_s15, 1  ;;  %p136_p1 = scmp.lt.s32.totalorder %s680_s15, 3 }
   0x4   : > { %p496_p2 = scmp.ne.s32.totalorder %s723_s19, 0  ;;  %p574_p3 = scmp.eq.s32.totalorder %s723_s19, 0 }
   0x5   : > { %p137_p4 = pnand %p495_p0, %p136_p1  ;;  %s682_s20 = smov [#allocation3]  }
   0x6   : > { %s152_s21 = sshll.u32 %s682_s20, 4  ;;  %s683_s22 = smov 64   ;;  %s153_s21 = int_to_ptr.vmem [resolvable:$true] %s152_s21 }
   0x7   : > { %p570_p5 = pneg %p137_p4  ;;  %s684_s23 = smov 4  }
   0x8   : > { %186 = sbr.rel (%p137_p4) target bundleno = 681 (0x2a9), region = 36 }
   0x9   : > { %p571_p6 = pnand %p574_p3, %p570_p5 }
   0xb   : > { %573 = dma.hbm_to_vmem [thread:$0]  (!%p571_p6), %s151_s18, 1024, %s153_s21, [#allocation4], %s683_s22, %s683_s22, %s684_s23  }
   0xd   : > { %671 = dma.done.wait (%p574_p3), [#allocation4], 1024  }
   0xe   : > { %673 = vsyncadd (%p574_p3), [#allocation4], 4294966272  ;;  %s500_s24 = sshll.u32 %s723_s19, 1 }
   0xf   : > { %p214_p7 = scmp.lt.s32.totalorder %s500_s24, 3  ;;  %228 = sbr.rel (%p496_p2) target bundleno = 22 (0x16), region = 44 }
  0x11   : > { %s760_s24 = smov (!%p214_p7, %s500_s24), 3 }
  0x12   : > { %s501_s25 = sshll.u32 %s760_s24, 3  ;;  %s503_s26 = sshll.u32 %s760_s24, 2 }
  0x13   : > { %s217_s29 = scalar_lea.vmem %s754_s0, %s501_s25  ;;  %s223_s6 = scalar_lea.vmem %s756_s2, %s503_s26 }
  0x14   : > { %vm229_vm0 = vcmask 0   ;;  %v685_v0 = vmov 0.0  }
  0x15   : > { %230 = vst.msk [vmem:[#allocation2] sm:$0x1] %vm229_vm0, %v685_v0 }
  0x16 PF: > { %v559_v1 = vld [vmem:[#allocation3 + $0x38] sm:$0xff]  ;;  %v558_v2 = vld [vmem:[#allocation3 + $0x30] sm:$0xff]  ;;  %v557_v3 = vld [vmem:[#allocation3 + $0x28] sm:$0xff]  ;;  %v686_v7 = vmov 0   ;;  %s543_s9 = sshll.u32 %s723_s19, 4  ;;  %v335_v17 = vlaneseq  ;;  %v687_v22 = vmov 0.0  }
  0x17   : > { %303 = vmatpush.bf16.xpose.msra.mxu0 %v559_v1  ;;  %v556_v4 = vld [vmem:[#allocation3 + $0x20] sm:$0xff]  ;;  %v555_v5 = vld [vmem:[#allocation3 + $0x18] sm:$0xff]  ;;  %593 = vset.pattern.permute.xlu1 %v686_v7  ;;  %v554_v8 = vld [vmem:[#allocation3 + $0x10] sm:$0xff]  ;;  %v340_v19 = vstv %s543_s9  ;;  %vm398_vm10 = vcmask 7168   ;;  %vm413_vm11 = vcmask 0   ;;  %p546_p8 = scmp.ne.s32.totalorder %s723_s19, 1 }
  0x18   : > { %v317_v6 = vld [vmem:[%s217_s29] sm:$0xff]  ;;  %594 = vset.pattern.permute.xlu0 %v686_v7  ;;  %v553_v9 = vld [vmem:[#allocation3 + $0x8] sm:$0xff]  ;;  %v338_v18 = vshrl.u32 %v335_v17, 7  ;;  %v336_v20 = vand.u32 127, %v335_v17 }
  0x19   : > { %321 = vperm.xlu1 %593, %v317_v6   ;;  %v552_v10 = vld [vmem:[#allocation3] sm:$0xff]  ;;  %v595_v15 = vld [vmem:[%s755_s1] ss:$0 sm:$0xff] }
  0x1a   : > { %v551_v11 = vld [vmem:[%s223_s6] sm:$0xff]  ;;  %v318_v12 = vld [vmem:[%s217_s29 + $0x8] sm:$0xff]  ;;  %v742_v21 = vadd.s32 %v340_v19, %v338_v18  ;;  %vm343_vm2 = vcmp.lt.s32.totalorder %v336_v20, 32  ;;  %v339_v26 = vadd.s32 8, %v338_v18 }
  0x1c   : > { %vm344_vm3 = vcmp.ne.s32.totalorder %v336_v20, %v742_v21  ;;  %v342_v27 = vadd.s32 %v340_v19, %v339_v26  ;;  %vm394_vm8 = vcmp.lt.s32.totalorder %v742_v21, 32 }
  0x1d   : > { %vm346_vm4 = vmand %vm343_vm2, %vm344_vm3 }
  0x1e   : > { %v544_v24 = vsel %vm346_vm4, 1.0, %v687_v22  ;;  %vm345_vm5 = vcmp.ne.s32.totalorder %v336_v20, %v342_v27  ;;  %vm395_vm9 = vcmp.lt.s32.totalorder %v342_v27, 32 }
  0x1f   : > { %304 = vmatpush.bf16.xpose.msra.mxu0 %v558_v2  ;;  %vm347_vm7 = vmand %vm343_vm2, %vm345_vm5 }
  0x20   : > { %v545_v30 = vsel %vm347_vm7, 1.0, %v687_v22 }
  0x21   : > { %324 = vperm.xlu1 %593, %v318_v12   ;;  %v333_v12 = vld [vmem:[#allocation2] sm:$0x1] }
  0x27   : > { %305 = vmatpush.bf16.xpose.msra.mxu0 %v557_v3 }
  0x2f   : > { %306 = vmatpush.bf16.xpose.msra.mxu0 %v556_v4 }
  0x37   : > { %307 = vmatpush.bf16.xpose.msra.mxu0 %v555_v5 }
  0x3f   : > { %308 = vmatpush.bf16.xpose.msra.mxu0 %v554_v8 }
  0x47   : > { %309 = vmatpush.bf16.xpose.msra.mxu0 %v553_v9 }
  0x4f   : > { %310 = vmatpush.bf16.xpose.msra.mxu0 %v552_v10 }
  0x56   : > { %311 = vmatmul.bf16.vlgmr.msra.gmra.mxu0 %v551_v11 }
  0x8b   : > { %v322_v16 = vpop.permute.xlu1 %321 }
  0x8c   : > { %vm327_vm1 = vcmp.eq.s32.totalorder %v322_v16, %v595_v15 }
  0x8d   : > { %v541_v23 = vsel %vm327_vm1, 1.0, %v687_v22 }
  0x8e   : > { %v352_v25 = vmul.f32 %v544_v24, %v541_v23 }
  0x93   : > { %v325_v28 = vpop.permute.xlu1 %324 }
  0x94   : > { %vm328_vm6 = vcmp.eq.s32.totalorder %v325_v28, %v595_v15 }
  0x95   : > { %v542_v29 = vsel %vm328_vm6, 1.0, %v687_v22 }
  0x96   : > { %v353_v31 = vmul.f32 %v545_v30, %v542_v29 }
  0x98   : > { %382 = vadd.xlane.f32.xlu1 %v353_v31 }
  0xd3   : > { %v312_v13 = vpop.f32.mrf.mxu0 }
  0xd4   : > { %354 = vmax.xlane.f32.xlu0 %v312_v13 }
  0xdb   : > { %v314_v14 = vpop.f32.mrf.mxu0 }
  0xdc   : > { %356 = vmax.xlane.f32.xlu0 %v314_v14 }
  0xe4   : > { %380 = vadd.xlane.f32.xlu0 %v352_v25 }
 0x10b   : > { %v383_v48 = vpop.xlane.xlu1 %382 }
 0x10c   : > { %v385_v51 = vmax.f32 %v383_v48, 1.0 }
 0x147   : > { %v355_v32 = vpop.xlane.xlu0 %354 }
 0x148   : > { %v358_v33 = vsub.f32 %v312_v13, %v355_v32 }
 0x14a   : > { %v360_v34 = vmul.f32 1.442695, %v358_v33  ;;  %v374_v43 = vmul.f32 %v358_v33, %v352_v25 }
 0x14c   : > { %596 = vpow2.f32 %v360_v34 }
 0x14f   : > { %v357_v35 = vpop.xlane.xlu0 %356 }
 0x150   : > { %v359_v36 = vsub.f32 %v314_v14, %v357_v35 }
 0x152   : > { %v597_v37 = vpop.eup %596  ;;  %v362_v38 = vmul.f32 1.442695, %v359_v36  ;;  %v375_v39 = vmul.f32 %v359_v36, %v353_v31 }
 0x153   : > { %v364_v40 = vmul.f32 %v597_v37, %v544_v24 }
 0x154   : > { %598 = vpow2.f32 %v362_v38  ;;  %378 = vadd.xlane.f32.xlu0 %v375_v39 }
 0x155   : > { %366 = vadd.xlane.f32.xlu2 %v364_v40 }
 0x157   : > { %v381_v45 = vpop.xlane.xlu0 %380 }
 0x158   : > { %v384_v47 = vmax.f32 %v381_v45, 1.0 }
 0x15a   : > { %v599_v41 = vpop.eup %598 }
 0x15b   : > { %v365_v42 = vmul.f32 %v599_v41, %v545_v30 }
 0x15d   : > { %368 = vadd.xlane.f32.xlu2 %v365_v42 }
 0x165   : > { %376 = vadd.xlane.f32.xlu2 %v374_v43 }
 0x1c7   : > { %v379_v59 = vpop.xlane.xlu0 %378 }
 0x1c8   : > { %v367_v44 = vpop.xlane.xlu2 %366 }
 0x1c9   : > { %600 = vlog2.f32 %v367_v44 }
 0x1cf   : > { %v601_v46 = vpop.eup %600 }
 0x1d0   : > { %v369_v49 = vpop.xlane.xlu2 %368  ;;  %v371_v50 = vmul.f32 0.6931472, %v601_v46 }
 0x1d1   : > { %602 = vlog2.f32 %v369_v49 }
 0x1d2   : > { %604 = vrcp.f32 %v384_v47  ;;  %v388_v53 = vmul.f32 %v381_v45, %v371_v50 }
 0x1d3   : > { %606 = vrcp.f32 %v385_v51 }
 0x1d7   : > { %v603_v52 = vpop.eup %602 }
 0x1d8   : > { %v373_v54 = vmul.f32 0.6931472, %v603_v52  ;;  %v377_v55 = vpop.xlane.xlu2 %376  ;;  %v605_v57 = vpop.eup %604 }
 0x1d9   : > { %v390_v56 = vsub.f32 %v377_v55, %v388_v53  ;;  %v607_v62 = vpop.eup %606 }
 0x1da   : > { %v389_v58 = vmul.f32 %v383_v48, %v373_v54 }
 0x1db   : > { %v392_v60 = vmul.f32 %v605_v57, %v390_v56 }
 0x1dc   : > { %v391_v61 = vsub.f32 %v379_v59, %v389_v58 }
 0x1dd   : > { %v396_v0 = vsel %vm394_vm8, %v392_v60, 0.0 }
 0x1de   : > { %v393_v63 = vmul.f32 %v607_v62, %v391_v61  ;;  %v399_v2 = vsel %vm398_vm10, %v396_v0, 0.0 }
 0x1e0   : > { %v397_v1 = vsel %vm395_vm9, %v393_v63, 0.0 }
 0x1e1   : > { %v400_v3 = vsel %vm398_vm10, %v397_v1, 0.0 }
 0x1e2   : > { %v401_v4 = vadd.f32 %v400_v3, %v399_v2 }
 0x1e4   : > { %402 = vadd.xlane.f32.xlu2 %v401_v4 }
 0x257   : > { %v403_v5 = vpop.xlane.xlu2 %402 }
 0x258   : > { %v404_v6 = vrot.slane %v403_v5, 4 }
 0x25a   : > { %v405_v7 = vadd.f32 %v404_v6, %v403_v5 }
 0x25c   : > { %v406_v8 = vrot.slane %v405_v7, 2 }
 0x25e   : > { %v407_v9 = vadd.f32 %v406_v8, %v405_v7 }
 0x260   : > { %v408_v10 = vrot.slane %v407_v9, 1 }
 0x262   : > { %v409_v11 = vadd.f32 %v408_v10, %v407_v9 }
 0x264   : > { %560 = vpush %v409_v11 }
 0x295   : > { %s561_s10 = spop %560  ;;  %418 = sbr.rel (%p546_p8) target bundleno = 676 (0x2a4), region = 48 }
 0x296   : > { %v411_v13 = vstv %s561_s10 }
 0x297   : > { %v412_v14 = vadd.f32 %v411_v13, %v333_v12 }
 0x299   : > { %414 = vst.msk [vmem:[#allocation2] sm:$0x1] %vm413_vm11, %v412_v14 }
 0x2a0   : > { %v419_v15 = vld [vmem:[#allocation2] sm:$0x1] }
 0x2a1   : > { %v420_v16 = vmul.f32 -0.03125, %v419_v15 }
 0x2a3   : > { %421 = vst.msk [vmem:[#allocation6] sm:$0x1] %vm413_vm11, %v420_v16 }
 0x2a4 PF: > { %p576_p9 = scmp.eq.s32.totalorder %s723_s19, 1  ;;  %s688_s11 = smov [#allocation6]  }
 0x2a5   : > { %s428_s12 = sshll.u32 %s688_s11, 4  ;;  %s430_s16 = sshll.u32 %s758_s4, 4  ;;  %s429_s12 = int_to_ptr.vmem [resolvable:$true] %s428_s12  ;;  %s431_s16 = int_to_ptr.hbm [resolvable:$true] %s430_s16 }
 0x2a6   : > { %567 = dma.vmem_to_hbm [thread:$0]  (%p576_p9), %s429_s12, 16, %s431_s16, [#allocation5]  }
 0x2a7   : > { %675 = dma.done.wait (%p576_p9), [#allocation5], 16  }
 0x2a8   : > { %677 = vsyncadd (%p576_p9), [#allocation5], 4294967280 }
 0x2a9 PF: > { %s16_s15 = sadd.s32 1, %s680_s15  }
 0x2aa   : > { %p13_p10 = scmp.ge.s32.totalorder %s16_s15, 4  }
 0x2ac   :  { %15 = sbr.rel (!%p13_p10) target bundleno = 2 (0x2), region = 79 }
 0x2b1   :  { %444 = vsyncpa [#allocation4], 1 }
 0x2b2   :  { %446 = vsyncpa [#allocation4 + $0x1], 1 }
 0x2b3   :  { %447 = vsyncpa [#allocation5], 1 }
 0x2b4   :  { %449 = vsyncpa [#allocation5 + $0x1], 1 }

</bundles_post_ra>
